<compile_context>
chip_gen: v5e
topology: v5e:2x2
jax: 0.10.0
libtpu: 0.0.40
codegen_flags: <defaults>
</compile_context>

<pallas_src>
import jax
import jax.numpy as jnp
from jax.experimental import pallas as pl
from jax.experimental.pallas import tpu as pltpu


def mask_attention_kernel(x_ref, mask_ref, w_ref, out_ref, score_ref):
    # x_ref:     (BB, L, D)   batch block
    # mask_ref:  (BB, L)      int32, 0 = masked out
    # w_ref:     (1, D)       Linear weight (out_features=1, in_features=D)
    # out_ref:   (BB, D)
    # score_ref: (BB, L)
    x = x_ref[...].astype(jnp.float32)        # (BB, L, D)
    w = w_ref[...]                            # (1, D)

    # logits[b, l] = sum_d x[b, l, d] * w[0, d]
    # VPU multiply + lane reduce; keeps x in its natural lane layout.
    logits = jnp.sum(x * w[None, :, :], axis=-1)          # (BB, L)

    # masked_fill(mask == 0, -inf)
    logits = jnp.where(mask_ref[...] == 0, -jnp.inf, logits)

    # numerically stable softmax over L
    mx = jnp.max(logits, axis=-1, keepdims=True)           # (BB, 1)
    p = jnp.exp(logits - mx)                                # (BB, L)
    denom = jnp.sum(p, axis=-1, keepdims=True)              # (BB, 1)
    score = p / denom                                       # (BB, L)

    # out[b, d] = sum_l score[b, l] * x[b, l, d]
    # VPU multiply + sublane reduce over L.
    out = jnp.sum(score[:, :, None] * x, axis=1)            # (BB, D)

    out_ref[...] = out.astype(out_ref.dtype)
    score_ref[...] = score.astype(score_ref.dtype)


def _pick_batch_block(B, L, D, itemsize, target_bytes=8 << 20):
    """Largest batch block whose (BB, L, D) slab is ~<= target_bytes.

    Prefers BB == B or a multiple of 8 dividing B so the 2-D mask/out/score
    blocks stay sublane-aligned.
    """
    cap = max(1, target_bytes // (L * D * itemsize))
    if B <= cap:
        return B
    for bb in range(min(B, cap), 0, -1):
        if B % bb == 0 and bb % 8 == 0:
            return bb
    for bb in range(min(B, cap), 0, -1):
        if B % bb == 0:
            return bb
    return 1


def mask_attention(x, mask, weight, bias=None):
    """x: (B, L, D) float32, mask: (B, L) int, weight: (1, D), bias: (1,) (unused).

    bias is accepted for API parity with nn.Linear(input_dim, 1) but not used:
    softmax is invariant to a constant shift of the logits, so the bias cannot
    change either returned tensor.
    """
    del bias
    B, L, D = x.shape
    bb = _pick_batch_block(B, L, D, x.dtype.itemsize)
    grid = (B // bb,)

    mask_i32 = mask.astype(jnp.int32)
    w = weight.astype(jnp.float32).reshape(1, D)

    itemsize = x.dtype.itemsize
    cost = pl.CostEstimate(
        flops=4 * B * L * D,                      # mul+add for logits and for out
        transcendentals=B * L,                    # exp
        bytes_accessed=(B * L * D * itemsize      # x read
                        + B * L * 4               # mask read
                        + D * 4                   # weight read
                        + B * D * itemsize        # out write
                        + B * L * 4),             # score write
    )

    out, score = pl.pallas_call(
        mask_attention_kernel,
        out_shape=(
            jax.ShapeDtypeStruct((B, D), x.dtype),       # output
            jax.ShapeDtypeStruct((B, L), jnp.float32),   # score (pre-unsqueeze)
        ),
        grid=grid,
        in_specs=[
            pl.BlockSpec((bb, L, D), lambda i: (i, 0, 0)),
            pl.BlockSpec((bb, L), lambda i: (i, 0)),
            pl.BlockSpec((1, D), lambda i: (0, 0)),
        ],
        out_specs=(
            pl.BlockSpec((bb, D), lambda i: (i, 0)),
            pl.BlockSpec((bb, L), lambda i: (i, 0)),
        ),
        compiler_params=pltpu.CompilerParams(
            dimension_semantics=("parallel",),
            vmem_limit_bytes=48 * 1024 * 1024,   # fits v7x's 64 MiB physical VMEM
        ),
        cost_estimate=cost,
    )(x, mask_i32, w)

    # PyTorch returns score as (B, 1, L); reshape is free wrapper-side plumbing.
    return out, score[:, None, :]


def _reference(x, mask, weight, bias):
    # Pure-JAX reference mirroring the PyTorch forward (including the bias).
    logits = jnp.einsum('bld,od->blo', x, weight)[..., 0] + bias[0]   # (B, L)
    logits = jnp.where(mask == 0, -jnp.inf, logits)
    score = jax.nn.softmax(logits, axis=-1)[:, None, :]               # (B, 1, L)
    out = jnp.matmul(score, x)[:, 0, :]                               # (B, D)
    return out, score


if __name__ == "__main__":
    B, L, D = 2, 8, 32   # batch, seq, hidden (input_dim = D)

    key = jax.random.PRNGKey(0)
    kx, kw, kb = jax.random.split(key, 3)

    x = jax.random.normal(kx, (B, L, D), dtype=jnp.float32)

    # mask: 1 = keep, 0 = masked out (tail positions masked per batch element)
    mask = jnp.array([[1, 1, 1, 1, 1, 1, 0, 0],
                      [1, 1, 1, 1, 0, 0, 0, 0]], dtype=jnp.int32)

    # nn.Linear(input_dim, 1) parameters, deterministic init (PyTorch-style uniform)
    bound = 1.0 / (D ** 0.5)
    weight = jax.random.uniform(kw, (1, D), jnp.float32, -bound, bound)
    bias = jax.random.uniform(kb, (1,), jnp.float32, -bound, bound)

    out, score = mask_attention(x, mask, weight, bias)
    out, score = jax.block_until_ready((out, score))

    ref_out, ref_score = _reference(x, mask, weight, bias)
    assert out.shape == (B, D) and score.shape == (B, 1, L)
    assert jnp.allclose(out, ref_out, atol=1e-5, rtol=1e-5)
    assert jnp.allclose(score, ref_score, atol=1e-5, rtol=1e-5)

    print("KERNEL_OK")
</pallas_src>

<mosaic_0001>
module attributes {stable_mosaic.version = 11 : i64} {
  func.func @mask_attention_kernel(%arg0: i32, %arg1: memref<2x8x32xf32, #tpu.memory_space<vmem>>, %arg2: memref<2x8xi32, #tpu.memory_space<vmem>>, %arg3: memref<1x32xf32, #tpu.memory_space<vmem>>, %arg4: memref<2x32xf32, #tpu.memory_space<vmem>>, %arg5: memref<2x8xf32, #tpu.memory_space<vmem>>) attributes {dimension_semantics = [#tpu.dimension_semantics<parallel>], iteration_bounds = array<i64: 1>, scalar_prefetch = 0 : i64, scratch_operands = 0 : i64, tpu.core_type = #tpu.core_type<tc>, window_params = [{transform_indices = @transform_0, window_bounds = array<i64: 2, 8, 32>}, {transform_indices = @transform_1, window_bounds = array<i64: 2, 8>}, {pipeline_mode = #tpu.pipeline_mode<synchronous>, transform_indices = @transform_2, window_bounds = array<i64: 1, 32>}, {transform_indices = @transform_3, window_bounds = array<i64: 2, 32>}, {transform_indices = @transform_4, window_bounds = array<i64: 2, 8>}]} {
    %c0 = arith.constant 0 : index
    %c0_0 = arith.constant 0 : index
    %c0_1 = arith.constant 0 : index
    %0 = vector.load %arg1[%c0, %c0_0, %c0_1] : memref<2x8x32xf32, #tpu.memory_space<vmem>>, vector<2x8x32xf32>
    %c0_2 = arith.constant 0 : index
    %c0_3 = arith.constant 0 : index
    %1 = vector.load %arg3[%c0_2, %c0_3] : memref<1x32xf32, #tpu.memory_space<vmem>>, vector<1x32xf32>
    %2 = vector.shape_cast %1 : vector<1x32xf32> to vector<1x1x32xf32>
    %3 = vector.broadcast %2 : vector<1x1x32xf32> to vector<2x8x32xf32>
    %4 = arith.mulf %0, %3 : vector<2x8x32xf32>
    %cst = arith.constant dense<0.000000e+00> : vector<2x8xf32>
    %5 = vector.multi_reduction <add>, %4, %cst [2] : vector<2x8x32xf32> to vector<2x8xf32>
    %c0_4 = arith.constant 0 : index
    %c0_5 = arith.constant 0 : index
    %6 = vector.load %arg2[%c0_4, %c0_5] : memref<2x8xi32, #tpu.memory_space<vmem>>, vector<2x8xi32>
    %c0_i32 = arith.constant 0 : i32
    %7 = vector.broadcast %c0_i32 : i32 to vector<2x8xi32>
    %8 = arith.cmpi eq, %6, %7 : vector<2x8xi32>
    %cst_6 = arith.constant 0xFF800000 : f32
    %9 = vector.broadcast %cst_6 : f32 to vector<2x8xf32>
    %10 = arith.select %8, %9, %5 : vector<2x8xi1>, vector<2x8xf32>
    %cst_7 = arith.constant dense<0xFF800000> : vector<2xf32>
    %11 = vector.multi_reduction <maximumf>, %10, %cst_7 [1] : vector<2x8xf32> to vector<2xf32>
    %12 = vector.shape_cast %11 : vector<2xf32> to vector<2x1xf32>
    %13 = vector.broadcast %12 : vector<2x1xf32> to vector<2x8xf32>
    %14 = arith.subf %10, %13 : vector<2x8xf32>
    %15 = math.exp %14 : vector<2x8xf32>
    %cst_8 = arith.constant dense<0.000000e+00> : vector<2xf32>
    %16 = vector.multi_reduction <add>, %15, %cst_8 [1] : vector<2x8xf32> to vector<2xf32>
    %17 = vector.shape_cast %16 : vector<2xf32> to vector<2x1xf32>
    %18 = vector.broadcast %17 : vector<2x1xf32> to vector<2x8xf32>
    %19 = arith.divf %15, %18 : vector<2x8xf32>
    %20 = vector.shape_cast %19 : vector<2x8xf32> to vector<2x8x1xf32>
    %21 = vector.broadcast %20 : vector<2x8x1xf32> to vector<2x8x32xf32>
    %22 = arith.mulf %21, %0 : vector<2x8x32xf32>
    %cst_9 = arith.constant dense<0.000000e+00> : vector<2x32xf32>
    %23 = vector.multi_reduction <add>, %22, %cst_9 [1] : vector<2x8x32xf32> to vector<2x32xf32>
    %c0_10 = arith.constant 0 : index
    %c0_11 = arith.constant 0 : index
    %24 = vector.load %arg4[%c0_10, %c0_11] : memref<2x32xf32, #tpu.memory_space<vmem>>, vector<2x32xf32>
    tpu.vector_store %arg4[%c0_10, %c0_11], %23 {strides = array<i32>} : memref<2x32xf32, #tpu.memory_space<vmem>>, vector<2x32xf32>,
    %c0_12 = arith.constant 0 : index
    %c0_13 = arith.constant 0 : index
    %25 = vector.load %arg5[%c0_12, %c0_13] : memref<2x8xf32, #tpu.memory_space<vmem>>, vector<2x8xf32>
    tpu.vector_store %arg5[%c0_12, %c0_13], %19 {strides = array<i32>} : memref<2x8xf32, #tpu.memory_space<vmem>>, vector<2x8xf32>,
    return
  }
  func.func @transform_0(%arg0: i32) -> (i32, i32, i32) {
    %c0_i32 = arith.constant 0 : i32
    %c0_i32_0 = arith.constant 0 : i32
    %c0_i32_1 = arith.constant 0 : i32
    return %arg0, %c0_i32, %c0_i32_0 : i32, i32, i32
  }
  func.func @transform_1(%arg0: i32) -> (i32, i32) {
    %c0_i32 = arith.constant 0 : i32
    %c0_i32_0 = arith.constant 0 : i32
    return %arg0, %c0_i32 : i32, i32
  }
  func.func @transform_2(%arg0: i32) -> (i32, i32) {
    %c0_i32 = arith.constant 0 : i32
    %c0_i32_0 = arith.constant 0 : i32
    %c0_i32_1 = arith.constant 0 : i32
    return %c0_i32, %c0_i32_0 : i32, i32
  }
  func.func @transform_3(%arg0: i32) -> (i32, i32) {
    %c0_i32 = arith.constant 0 : i32
    %c0_i32_0 = arith.constant 0 : i32
    return %arg0, %c0_i32 : i32, i32
  }
  func.func @transform_4(%arg0: i32) -> (i32, i32) {
    %c0_i32 = arith.constant 0 : i32
    %c0_i32_0 = arith.constant 0 : i32
    return %arg0, %c0_i32 : i32, i32
  }
}

</mosaic_0001>

<bundles_post_ra>
// kernel: tpu_custom_call.1
= control target key start
LH: loop header
LB: loop body
LE: loop exit
PB: predicated region body
PF: predicated region fallthrough
CT: control target
= control target key end

     0   :  { %10 = vsyncpa [#allocation3], 0  ;;  %s351_s0 = inlined_call_operand.hbm [shape: f32[2,8,32], index: 0, kind: input, shape index: {}]   ;;  %s352_s1 = inlined_call_operand.hbm [shape: s32[2,8], index: 1, kind: input, shape index: {}]   ;;  %s353_s2 = inlined_call_operand.vmem [shape: f32[1,32], index: 2, kind: input, shape index: {}]   ;;  %s354_s3 = inlined_call_operand.hbm [shape: f32[2,32], index: 3, kind: output, shape index: {0}]   ;;  %s355_s4 = inlined_call_operand.hbm [shape: f32[2,8], index: 4, kind: output, shape index: {1}]  }
   0x1   :  { %11 = vsyncpa [#allocation6], 0 }
   0x2   :  { %12 = vsyncpa [#allocation4], 0 }
   0x3   :  { %13 = vsyncpa [#allocation9], 0  ;;  %s18_s17 = sshll.u32 %s351_s0, 4  ;;  %s288_s18 = smov [#allocation2]   ;;  %s19_s17 = int_to_ptr.hbm [resolvable:$true] %s18_s17 }
   0x4   :  { %s20_s19 = sshll.u32 %s288_s18, 4  ;;  %s32_s22 = sshll.u32 %s352_s1, 4  ;;  %s21_s19 = int_to_ptr.vmem [resolvable:$true] %s20_s19  ;;  %s33_s22 = int_to_ptr.hbm [resolvable:$true] %s32_s22 }
   0x5   :  { %s289_s23 = smov 128   ;;  %s290_s24 = smov 8  }
   0x6   :  { %26 = dma.hbm_to_vmem [thread:$0]  %s19_s17, 256, %s21_s19, [#allocation3], %s289_s23, %s289_s23, %s290_s24  }
   0x7   :  { %s291_s25 = smov [#allocation5]  }
   0x8   :  { %s34_s26 = sshll.u32 %s291_s25, 4  ;;  %s35_s26 = int_to_ptr.vmem [resolvable:$true] %s34_s26 }
   0x9   :  { %37 = dma.hbm_to_vmem [thread:$0]  %s33_s22, 32, %s35_s26, [#allocation6]  }
   0xa   :  { %280 = dma.done.wait [#allocation3], 256  }
   0xb   :  { %281 = vsyncadd [#allocation3], 4294967040 }
   0xc   :  { %282 = dma.done.wait [#allocation6], 32  }
   0xd   :  { %283 = vsyncadd [#allocation6], 4294967264  ;;  %v325_v0 = vld [vmem:[#allocation2] sm:$0xff]  ;;  %vm56_vm0 = vcmask 261120   ;;  %v331_v3 = vld [vmem:[#allocation2 + $0x8] sm:$0xff]  ;;  %v67_v8 = vlaneseq  ;;  %vm71_vm1 = vcmask 1041409  }
   0xe   :  { %v179_v1 = vld [vmem:[%s353_s2] ss:$0 sm:$0xff]  ;;  %v63_v10 = vld [vmem:[#allocation5] sm:$0x3]  ;;  %vm75_vm3 = vcmask 58368   ;;  %s292_s1 = smov [#allocation8]  }
   0xf   :  { %v54_v2 = vmul.f32 %v179_v1, %v325_v0  ;;  %v55_v5 = vmul.f32 %v179_v1, %v331_v3  ;;  %v68_v9 = vand.u32 127, %v67_v8  ;;  %vm64_vm2 = vcmp.eq.s32.totalorder %v63_v10, 0  ;;  %s153_s2 = sshll.u32 %s292_s1, 4  ;;  %s155_s30 = sshll.u32 %s355_s4, 4  ;;  %s154_s2 = int_to_ptr.vmem [resolvable:$true] %s153_s2  ;;  %s156_s30 = int_to_ptr.hbm [resolvable:$true] %s155_s30 }
  0x10   :  { %v102_v22 = vshrl.u32 %v67_v8, 7  ;;  %s293_s4 = smov [#allocation7]   ;;  %s144_s8 = sshll.u32 %s354_s3, 4  ;;  %vm134_vm8 = vcmask 254976   ;;  %s145_s8 = int_to_ptr.hbm [resolvable:$true] %s144_s8 }
  0x11   :  { %v57_v4 = vsel %vm56_vm0, %v54_v2, 0.0  ;;  %v60_v6 = vsel %vm56_vm0, %v55_v5, 0.0  ;;  %s142_s5 = sshll.u32 %s293_s4, 4  ;;  %s143_s5 = int_to_ptr.vmem [resolvable:$true] %s142_s5 }
  0x12   :  { %58 = vadd.xlane.f32.xlu0 %v57_v4  ;;  %177 = vset.pattern.permute.xlu2 %v102_v22 }
  0x13   :  { %178 = vset.pattern.permute.xlu0 %v102_v22 }
  0x1a   :  { %61 = vadd.xlane.f32.xlu0 %v60_v6 }
  0x85   :  { %v59_v7 = vpop.xlane.xlu0 %58 }
  0x86   :  { %v69_v12 = vperm.slane %v59_v7, %v68_v9 }
  0x8d   :  { %v62_v11 = vpop.xlane.xlu0 %61 }
  0x8e   :  { %v70_v13 = vperm.slane %v62_v11, %v68_v9 }
  0x90   :  { %v72_v14 = vsel %vm71_vm1, %v70_v13, %v69_v12 }
  0x91   :  { %v74_v15 = vsel %vm64_vm2, -inf, %v72_v14 }
  0x92   :  { %v76_v16 = vsel %vm75_vm3, %v74_v15, -inf }
  0x93   :  { %77 = vmax.xlane.f32.xlu1 %v76_v16 }
 0x106   :  { %v78_v17 = vpop.xlane.xlu1 %77 }
 0x107   :  { %v79_v18 = vsub.f32 %v74_v15, %v78_v17 }
 0x109   :  { %v80_v19 = vmul.f32 1.442695, %v79_v18 }
 0x10b   :  { %180 = vpow2.f32 %v80_v19 }
 0x111   :  { %v181_v20 = vpop.eup %180 }
 0x112   :  { %v82_v21 = vsel %vm75_vm3, %v181_v20, 0.0 }
 0x113   :  { %83 = vadd.xlane.f32.xlu1 %v82_v21 }
 0x186   :  { %v84_v23 = vpop.xlane.xlu1 %83 }
 0x187   :  { %182 = vrcp.f32 %v84_v23  ;;  %v96_v27 = vand.u32 2147483648, %v84_v23  ;;  %v94_v29 = vand.u32 2147483647, %v84_v23  ;;  %vm90_vm5 = vweird.f32 %v84_v23 }
 0x189   :  { %v97_v31 = vor.u32 1.1754944e-38, %v96_v27  ;;  %vm95_vm7 = vcmp.eq.f32.partialorder %v94_v29, 8.507059e+37 }
 0x18d   :  { %v183_v24 = vpop.eup %182 }
 0x18e   :  { %v86_v25 = vmul.f32 %v183_v24, %v84_v23  ;;  %vm91_vm4 = vweird.f32 %v183_v24 }
 0x18f   :  { %vm92_vm6 = vmor %vm90_vm5, %vm91_vm4 }
 0x190   :  { %v87_v26 = vsub.f32 1.0, %v86_v25 }
 0x192   :  { %v88_v28 = vmul.f32 %v183_v24, %v87_v26 }
 0x194   :  { %v89_v30 = vadd.f32 %v183_v24, %v88_v28 }
 0x196   :  { %v93_v32 = vsel %vm92_vm6, %v183_v24, %v89_v30 }
 0x197   :  { %v98_v33 = vsel %vm95_vm7, %v97_v31, %v93_v32 }
 0x198   :  { %v99_v34 = vmul.f32 %v181_v20, %v98_v33 }
 0x19a   :  { %v100_v35 = vperm.slane %v99_v34, 0  ;;  %136 = vst.msk [vmem:[#allocation8] sm:$0x3] %vm75_vm3, %v99_v34  ;;  %v107_v36 = vperm.slane %v99_v34, 1 }
 0x19b   :  { %158 = dma.vmem_to_hbm [thread:$0]  %s154_s2, 32, %s156_s30, [#allocation9]  }
 0x19c   :  { %105 = vperm.xlu2 %177, %v100_v35  }
 0x1a4   :  { %112 = vperm.xlu2 %177, %v107_v36  }
 0x1f6   :  { %v106_v37 = vpop.permute.xlu2 %105 }
 0x1f7   :  { %v114_v38 = vmul.f32 %v106_v37, %v325_v0 }
 0x1f9   :  { %v116_v39 = vsel %vm56_vm0, %v114_v38, 0.0 }
 0x1fa   :  { %v117_v40 = vrot.slane %v116_v39, 4 }
 0x1fc   :  { %v118_v41 = vadd.f32 %v117_v40, %v116_v39 }
 0x1fe   :  { %v113_v42 = vpop.permute.xlu2 %112  ;;  %v119_v44 = vrot.slane %v118_v41, 2 }
 0x1ff   :  { %v115_v43 = vmul.f32 %v113_v42, %v331_v3 }
 0x200   :  { %v120_v47 = vadd.f32 %v119_v44, %v118_v41 }
 0x201   :  { %v123_v45 = vsel %vm56_vm0, %v115_v43, 0.0 }
 0x202   :  { %v124_v46 = vrot.slane %v123_v45, 4  ;;  %v121_v50 = vrot.slane %v120_v47, 1 }
 0x204   :  { %v125_v48 = vadd.f32 %v124_v46, %v123_v45  ;;  %v122_v53 = vadd.f32 %v121_v50, %v120_v47 }
 0x206   :  { %v126_v49 = vrot.slane %v125_v48, 2 }
 0x208   :  { %v127_v51 = vadd.f32 %v126_v49, %v125_v48 }
 0x20a   :  { %v128_v52 = vrot.slane %v127_v51, 1 }
 0x20c   :  { %v129_v54 = vadd.f32 %v128_v52, %v127_v51 }
 0x20e   :  { %v132_v55 = vsel %vm71_vm1, %v129_v54, %v122_v53 }
 0x20f   :  { %135 = vst.msk [vmem:[#allocation7] sm:$0x3] %vm134_vm8, %v132_v55 }
 0x210   :  { %147 = dma.vmem_to_hbm [thread:$0]  %s143_s5, 32, %s145_s8, [#allocation4]  }
 0x211   :  { %284 = dma.done.wait [#allocation4], 32  }
 0x212   :  { %285 = vsyncadd [#allocation4], 4294967264 }
 0x213   :  { %286 = dma.done.wait [#allocation9], 32  }
 0x214   :  { %287 = vsyncadd [#allocation9], 4294967264 }
 0x215   :  { %167 = vsyncpa [#allocation3], 1 }
 0x216   :  { %168 = vsyncpa [#allocation6], 1 }
 0x217   :  { %169 = vsyncpa [#allocation4], 1 }
 0x218   :  { %170 = vsyncpa [#allocation9], 1 }

</bundles_post_ra>
